<compile_context>
chip_gen: v5e
topology: v5e:2x2
jax: 0.10.0
libtpu: 0.0.40
codegen_flags: <defaults>
</compile_context>

<pallas_src>
import functools
import math

import numpy as np
import jax
import jax.numpy as jnp
from jax.experimental import pallas as pl
from jax.experimental.pallas import tpu as pltpu


# ----------------------------------------------------------------------------
# Glue: build the combined transform operator (parameter setup, plain numpy).
# ----------------------------------------------------------------------------
def _frft_matrix_np(n: int, order: float) -> np.ndarray:
    """N x N complex matrix A with A @ v == frft(v, order) (torch-frft `frft`
    semantics) for integer orders mod 4.  order == 1 -> centered DFT / sqrt(N)."""
    a = float(order) % 4.0
    eye = np.eye(n, dtype=np.complex64)
    if a == 0.0:
        mat = eye
    elif a == 2.0:
        mat = np.flipud(eye)
    elif a == 1.0:
        mat = (np.fft.fftshift(np.fft.fft(np.fft.ifftshift(eye, axes=0), axis=0), axes=0)
               / math.sqrt(n))
    elif a == 3.0:
        mat = (np.fft.fftshift(np.fft.ifft(np.fft.ifftshift(eye, axes=0), axis=0), axes=0)
               * math.sqrt(n))
    else:
        # TODO(synk): non-integer orders need the chirp-based Ozaktas fast FrFT;
        # it is also linear, so it would reduce to a matrix here as well.
        raise NotImplementedError("only integer FrFT orders are materialized")
    return mat.astype(np.complex64)


def _pooled_matrix_np(n: int, order: float) -> np.ndarray:
    """Fold the trailing fftshift and the [n//4 : n - n//4] center-crop into the
    FrFT matrix -> shape (n - 2*(n//4), n)."""
    mat = _frft_matrix_np(n, order)
    mat = np.fft.fftshift(mat, axes=0)  # fftshift applied to the transform output
    st = n // 4
    return mat[st:n - st, :]


def _build_operator(h: int, w: int, order1: float, order2: float):
    """Fused real|imag operator for one flattened slab.

    Returns (op_bf16, kh, kw, kp) where op_bf16 has shape (H*W, 2*Kp) with
    Kp a multiple of 128 (rows beyond Kh*Kw are zero), such that for a
    flattened un-padded slab x (length H*W):
        y = x @ op   ->   y[:Kp] = Re, y[Kp:] = Im  of the padded-frft-pool.
    """
    nh, nw = h + 1, w + 1
    kh = nh - 2 * (nh // 4)
    kw = nw - 2 * (nw // 4)

    # Per-axis pooled matrices; drop the column that multiplies the all-zero
    # pad row/col (last column of each), so no padded copy of x is ever needed.
    mh = _pooled_matrix_np(nh, order2)[:, :h]   # (Kh, H)   acts along H, order2
    mw = _pooled_matrix_np(nw, order1)[:, :w]   # (Kw, W)   acts along W, order1

    # Y[p, q] = sum_{i,j} mh[p, i] * X[i, j] * mw[q, j]
    # => vec(Y) = kron(mh, mw) @ vec(X)   (row-major flattening on both sides)
    op = np.kron(mh, mw).astype(np.complex64)   # (Kh*Kw, H*W)

    kp = ((kh * kw + 127) // 128) * 128         # lane-dense output half-width
    op_pad = np.zeros((kp, h * w), dtype=np.complex64)
    op_pad[: kh * kw] = op

    # Fuse Re and Im side by side: one (H*W, 2*Kp) matrix -> single MXU dot.
    op_t = np.concatenate([op_pad.T.real, op_pad.T.imag], axis=1)  # (H*W, 2*Kp)
    op_bf16 = jnp.asarray(np.ascontiguousarray(op_t), jnp.bfloat16)
    return op_bf16, kh, kw, kp


# ----------------------------------------------------------------------------
# Pallas kernel: one (G, H*W) block of slabs -> one fused matmul + magnitude.
# ----------------------------------------------------------------------------
def _frft_pool_kernel(x_ref, op_ref, o_ref, *, kp):
    # bf16 LHS x bf16 operator on the MXU with f32 accumulation; the single
    # fused dot produces [Re | Im] side by side (N = 2*Kp fills the MXU).
    x = x_ref[...].astype(jnp.bfloat16)                                    # (G, H*W)
    y = jnp.dot(x, op_ref[...], preferred_element_type=jnp.float32)       # (G, 2*Kp)
    re = y[:, :kp]                         # static, lane-aligned slices (Kp % 128 == 0)
    im = y[:, kp:]
    o_ref[...] = jnp.sqrt(re * re + im * im)                              # torch.abs


def _pick_block_rows(total: int, hw: int, kp: int, x_itemsize: int,
                     op_bytes: int, budget_bytes: int = 40 * 1024 * 1024) -> int:
    """Rows (slabs) per grid step, derived from a VMEM byte budget:
    double-buffered input + output blocks plus the resident operator must fit
    ~40 MiB (safe under v7x's 64 MiB physical VMEM and the 32 MiB scoped
    defaults elsewhere, once vmem_limit_bytes is raised).  Keep g a multiple of
    8 when it is not the full extent, and force >= 2 grid steps for total >= 16
    so megacore / 2-TC chips can shard the parallel grid axis."""
    per_row = 2 * (hw * x_itemsize + kp * 4)       # double-buffered in + out blocks
    avail = max(budget_bytes - op_bytes, per_row * 8)
    g = avail // per_row
    if total >= 16:
        g = min(g, (total + 1) // 2)               # at least 2 grid steps
    g = min(g, total)
    if g < total:
        g = max(8, (g // 8) * 8)
    return int(g)


def frft_pool(x: jnp.ndarray, order1: float = 1.0, order2: float = 1.0) -> jnp.ndarray:
    b, c, h, w = x.shape
    total = b * c
    hw = h * w

    op, kh, kw, kp = _build_operator(h, w, order1, order2)

    # Free, contiguous reshape in the input's NATIVE dtype -- no astype HBM pass.
    xf = x.reshape(total, hw)

    op_bytes = op.size * op.dtype.itemsize
    g = _pick_block_rows(total, hw, kp, xf.dtype.itemsize, op_bytes)

    cost = pl.CostEstimate(
        flops=2 * total * hw * (2 * kp),
        transcendentals=total * kp,
        bytes_accessed=(xf.size * xf.dtype.itemsize
                        + op_bytes
                        + total * kp * 4),
    )

    out = pl.pallas_call(
        functools.partial(_frft_pool_kernel, kp=kp),
        out_shape=jax.ShapeDtypeStruct((total, kp), jnp.float32),
        grid_spec=pltpu.PrefetchScalarGridSpec(
            num_scalar_prefetch=0,
            grid=(pl.cdiv(total, g),),
            in_specs=[
                pl.BlockSpec((g, hw), lambda i: (i, 0)),        # slab block
                # Resident fused operator (constant index_map across the grid).
                # TODO(synk): pipeline_mode=pl.Buffered(1) would drop its second
                # buffer; omitted to stay conservative across JAX versions.
                pl.BlockSpec((hw, 2 * kp), lambda i: (0, 0)),
            ],
            out_specs=pl.BlockSpec((g, kp), lambda i: (i, 0)),
        ),
        compiler_params=pltpu.CompilerParams(
            dimension_semantics=("parallel",),
            vmem_limit_bytes=48 * 1024 * 1024,
        ),
        cost_estimate=cost,
    )(xf, op)

    # Layout plumbing only: strip the lane padding and restore (B, C, Kh, Kw).
    return out[:, : kh * kw].reshape(b, c, kh, kw)


# ----------------------------------------------------------------------------
# Independent numpy reference (valid for the order == 1 path) for verification.
# ----------------------------------------------------------------------------
def _reference_np(x: np.ndarray) -> np.ndarray:
    x = np.asarray(x, dtype=np.float32)
    b, c, h, w = x.shape
    nh, nw = h + 1, w + 1
    xp = np.zeros((b, c, nh, nw), dtype=np.float32)
    xp[..., :h, :w] = x
    out = (np.fft.fftshift(np.fft.fft(np.fft.ifftshift(xp, axes=-1), axis=-1), axes=-1)
           / math.sqrt(nw))
    out = (np.fft.fftshift(np.fft.fft(np.fft.ifftshift(out, axes=-2), axis=-2), axes=-2)
           / math.sqrt(nh))
    out = np.fft.fftshift(np.fft.fftshift(out, axes=-1), axes=-2)
    st_h, st_w = nh // 4, nw // 4
    out = out[..., st_h:nh - st_h, st_w:nw - st_w]
    return np.abs(out)


if __name__ == "__main__":
    key = jax.random.PRNGKey(0)
    x = jax.random.normal(key, (2, 4, 16, 16), dtype=jnp.float32)

    # Deterministic "parameters": module __init__ default order -> order1 = order2 = 1.0
    out = jax.block_until_ready(frft_pool(x, order1=1.0, order2=1.0))

    assert out.shape == (2, 4, 9, 9), out.shape
    ref = _reference_np(np.asarray(x))
    # Tolerance reflects bf16 inputs/operator with f32 accumulation (~0.5-1% rel).
    np.testing.assert_allclose(np.asarray(out), ref, rtol=3e-2, atol=3e-2)

    print("KERNEL_OK")
</pallas_src>

<mosaic_0001>
module attributes {stable_mosaic.version = 11 : i64} {
  func.func @_frft_pool_kernel(%arg0: i32, %arg1: memref<8x256xf32, #tpu.memory_space<vmem>>, %arg2: memref<256x256xbf16, #tpu.memory_space<vmem>>, %arg3: memref<8x128xf32, #tpu.memory_space<vmem>>) attributes {dimension_semantics = [#tpu.dimension_semantics<parallel>], iteration_bounds = array<i64: 1>, scalar_prefetch = 0 : i64, scratch_operands = 0 : i64, tpu.core_type = #tpu.core_type<tc>, window_params = [{transform_indices = @transform_0, window_bounds = array<i64: 8, 256>}, {pipeline_mode = #tpu.pipeline_mode<synchronous>, transform_indices = @transform_1, window_bounds = array<i64: 256, 256>}, {transform_indices = @transform_2, window_bounds = array<i64: 8, 128>}]} {
    %c0 = arith.constant 0 : index
    %c0_0 = arith.constant 0 : index
    %0 = vector.load %arg1[%c0, %c0_0] : memref<8x256xf32, #tpu.memory_space<vmem>>, vector<8x256xf32>
    %1 = arith.truncf %0 : vector<8x256xf32> to vector<8x256xbf16>
    %c0_1 = arith.constant 0 : index
    %c0_2 = arith.constant 0 : index
    %2 = vector.load %arg2[%c0_1, %c0_2] : memref<256x256xbf16, #tpu.memory_space<vmem>>, vector<256x256xbf16>
    %cst = arith.constant dense<0.000000e+00> : vector<8x256xf32>
    %3 = tpu.matmul %1, %2, %cst {dimension_numbers = #tpu.dot_dimension_numbers<[1], [0], [0], [1], [0, 0, 1, 1], [], []>} : vector<8x256xbf16>, vector<256x256xbf16>, vector<8x256xf32> -> vector<8x256xf32>
    %4 = vector.extract_strided_slice %3 {offsets = [0, 0], sizes = [8, 128], strides = [1, 1]} : vector<8x256xf32> to vector<8x128xf32>
    %5 = vector.extract_strided_slice %3 {offsets = [0, 128], sizes = [8, 128], strides = [1, 1]} : vector<8x256xf32> to vector<8x128xf32>
    %6 = arith.mulf %4, %4 : vector<8x128xf32>
    %7 = arith.mulf %5, %5 : vector<8x128xf32>
    %8 = arith.addf %6, %7 : vector<8x128xf32>
    %9 = math.sqrt %8 : vector<8x128xf32>
    %c0_3 = arith.constant 0 : index
    %c0_4 = arith.constant 0 : index
    %10 = vector.load %arg3[%c0_3, %c0_4] : memref<8x128xf32, #tpu.memory_space<vmem>>, vector<8x128xf32>
    tpu.vector_store %arg3[%c0_3, %c0_4], %9 {strides = array<i32>} : memref<8x128xf32, #tpu.memory_space<vmem>>, vector<8x128xf32>,
    return
  }
  func.func @transform_0(%arg0: i32) -> (i32, i32) {
    %c0_i32 = arith.constant 0 : i32
    %c0_i32_0 = arith.constant 0 : i32
    return %arg0, %c0_i32 : i32, i32
  }
  func.func @transform_1(%arg0: i32) -> (i32, i32) {
    %c0_i32 = arith.constant 0 : i32
    %c0_i32_0 = arith.constant 0 : i32
    %c0_i32_1 = arith.constant 0 : i32
    return %c0_i32, %c0_i32_0 : i32, i32
  }
  func.func @transform_2(%arg0: i32) -> (i32, i32) {
    %c0_i32 = arith.constant 0 : i32
    %c0_i32_0 = arith.constant 0 : i32
    return %arg0, %c0_i32 : i32, i32
  }
}

</mosaic_0001>

<bundles_post_ra>
// kernel: tpu_custom_call.1
= control target key start
LH: loop header
LB: loop body
LE: loop exit
PB: predicated region body
PF: predicated region fallthrough
CT: control target
= control target key end

     0   :  { %7 = vsyncpa [#allocation3], 0  ;;  %s598_s0 = inlined_call_operand.hbm [shape: f32[8,256], index: 0, kind: input, shape index: {}]   ;;  %s599_s1 = inlined_call_operand.hbm [shape: bf16[256,256], index: 1, kind: input, shape index: {}]   ;;  %s600_s2 = inlined_call_operand.hbm [shape: f32[8,128], index: 2, kind: output, shape index: {}]  }
   0x1   :  { %8 = vsyncpa [#allocation6], 0 }
   0x2   :  { %9 = vsyncpa [#allocation4], 0  ;;  %s15_s11 = sshll.u32 %s598_s0, 4  ;;  %s569_s12 = smov [#allocation2]   ;;  %s16_s11 = int_to_ptr.hbm [resolvable:$true] %s15_s11 }
   0x3   :  { %s17_s13 = sshll.u32 %s569_s12, 4  ;;  %s25_s16 = sshll.u32 %s599_s1, 4  ;;  %s18_s13 = int_to_ptr.vmem [resolvable:$true] %s17_s13  ;;  %s26_s16 = int_to_ptr.hbm [resolvable:$true] %s25_s16 }
   0x4   :  { %20 = dma.hbm_to_vmem [thread:$0]  %s16_s11, 256, %s18_s13, [#allocation3]  }
   0x5   :  { %s570_s17 = smov [#allocation5]   ;;  %s571_s19 = smov 128  }
   0x6   :  { %s27_s18 = sshll.u32 %s570_s17, 4  ;;  %s572_s20 = smov 8   ;;  %s28_s18 = int_to_ptr.vmem [resolvable:$true] %s27_s18 }
   0x7   :  { %33 = dma.hbm_to_vmem [thread:$0]  %s26_s16, 4096, %s28_s18, [#allocation6], %s571_s19, %s571_s19, %s572_s20  }
   0x8   :  { %563 = dma.done.wait [#allocation3], 256  }
   0x9   :  { %564 = vsyncadd [#allocation3], 4294967040 }
   0xa   :  { %565 = dma.done.wait [#allocation6], 4096  }
   0xb   :  { %566 = vsyncadd [#allocation6], 4294963200  ;;  %v382_v0 = vld [vmem:[#allocation5 + $0x70] sm:$0xf]  ;;  %v467_v1 = vld [vmem:[#allocation5 + $0x74] sm:$0xf0] }
   0xc   :  { %v446_v2 = vld [vmem:[#allocation5 + $0xf0] sm:$0xf]  ;;  %v383_v3 = vor.u32 %v467_v1, %v382_v0  ;;  %v483_v4 = vld [vmem:[#allocation5 + $0xf4] sm:$0xf0]  ;;  %v466_v5 = vld [vmem:[#allocation5 + $0x74] sm:$0xf] }
   0xd   :  { %v384_v6 = vld [vmem:[#allocation5 + $0x78] sm:$0xf0]  ;;  %v447_v7 = vor.u32 %v483_v4, %v446_v2  ;;  %v482_v9 = vld [vmem:[#allocation5 + $0xf4] sm:$0xf]  ;;  %v374_v11 = vld [vmem:[#allocation5 + $0x60] sm:$0xf] }
   0xe   :  { %v387_v8 = vor.u32 %v466_v5, %v384_v6  ;;  %v448_v10 = vld [vmem:[#allocation5 + $0xf8] sm:$0xf0]  ;;  %238 = vmatpush.bf16.msra.mxu0 %v383_v3  ;;  %v465_v13 = vld [vmem:[#allocation5 + $0x64] sm:$0xf0]  ;;  %v438_v14 = vld [vmem:[#allocation5 + $0xe0] sm:$0xf] }
   0xf   :  { %v451_v12 = vor.u32 %v482_v9, %v448_v10  ;;  %v481_v15 = vld [vmem:[#allocation5 + $0xe4] sm:$0xf0]  ;;  %251 = vmatpush.bf16.msra.mxu1 %v447_v7  ;;  %v375_v16 = vor.u32 %v465_v13, %v374_v11  ;;  %v464_v18 = vld [vmem:[#allocation5 + $0x64] sm:$0xf]  ;;  %v376_v19 = vld [vmem:[#allocation5 + $0x68] sm:$0xf0] }
  0x10   :  { %264 = vmatpush.bf16.msra.mxu2 %v387_v8  ;;  %v439_v17 = vor.u32 %v481_v15, %v438_v14  ;;  %v480_v20 = vld [vmem:[#allocation5 + $0xe4] sm:$0xf]  ;;  %v379_v21 = vor.u32 %v464_v18, %v376_v19  ;;  %v440_v22 = vld [vmem:[#allocation5 + $0xe8] sm:$0xf0]  ;;  %v366_v23 = vld [vmem:[#allocation5 + $0x50] sm:$0xf] }
  0x11   :  { %277 = vmatpush.bf16.msra.mxu3 %v451_v12  ;;  %v463_v24 = vld [vmem:[#allocation5 + $0x54] sm:$0xf0]  ;;  %v443_v25 = vor.u32 %v480_v20, %v440_v22  ;;  %v430_v26 = vld [vmem:[#allocation5 + $0xd0] sm:$0xf]  ;;  %v462_v28 = vld [vmem:[#allocation5 + $0x54] sm:$0xf] }
  0x12   :  { %v479_v27 = vld [vmem:[#allocation5 + $0xd4] sm:$0xf0]  ;;  %239 = vmatpush.bf16.msra.mxu0 %v375_v16  ;;  %v367_v29 = vor.u32 %v463_v24, %v366_v23  ;;  %v368_v30 = vld [vmem:[#allocation5 + $0x58] sm:$0xf0]  ;;  %v478_v31 = vld [vmem:[#allocation5 + $0xd4] sm:$0xf] }
  0x13   :  { %v432_v32 = vld [vmem:[#allocation5 + $0xd8] sm:$0xf0]  ;;  %252 = vmatpush.bf16.msra.mxu1 %v439_v17  ;;  %v431_v33 = vor.u32 %v479_v27, %v430_v26  ;;  %v371_v34 = vor.u32 %v462_v28, %v368_v30  ;;  %v358_v35 = vld [vmem:[#allocation5 + $0x40] sm:$0xf]  ;;  %v461_v36 = vld [vmem:[#allocation5 + $0x44] sm:$0xf0] }
  0x14   :  { %265 = vmatpush.bf16.msra.mxu2 %v379_v21  ;;  %v422_v37 = vld [vmem:[#allocation5 + $0xc0] sm:$0xf]  ;;  %v435_v38 = vor.u32 %v478_v31, %v432_v32  ;;  %v477_v39 = vld [vmem:[#allocation5 + $0xc4] sm:$0xf0]  ;;  %v460_v40 = vld [vmem:[#allocation5 + $0x44] sm:$0xf]  ;;  %v359_v44 = vor.u32 %v461_v36, %v358_v35 }
  0x15   :  { %278 = vmatpush.bf16.msra.mxu3 %v443_v25  ;;  %v360_v41 = vld [vmem:[#allocation5 + $0x48] sm:$0xf0]  ;;  %v476_v42 = vld [vmem:[#allocation5 + $0xc4] sm:$0xf]  ;;  %v423_v45 = vor.u32 %v477_v39, %v422_v37  ;;  %v350_v47 = vld [vmem:[#allocation5 + $0x30] sm:$0xf] }
  0x16   :  { %v424_v43 = vld [vmem:[#allocation5 + $0xc8] sm:$0xf0]  ;;  %240 = vmatpush.bf16.msra.mxu0 %v367_v29  ;;  %v363_v46 = vor.u32 %v460_v40, %v360_v41  ;;  %v459_v48 = vld [vmem:[#allocation5 + $0x34] sm:$0xf0]  ;;  %v414_v49 = vld [vmem:[#allocation5 + $0xb0] sm:$0xf] }
  0x17   :  { %253 = vmatpush.bf16.msra.mxu1 %v431_v33  ;;  %v427_v50 = vor.u32 %v476_v42, %v424_v43  ;;  %v475_v51 = vld [vmem:[#allocation5 + $0xb4] sm:$0xf0]  ;;  %v458_v52 = vld [vmem:[#allocation5 + $0x34] sm:$0xf]  ;;  %v352_v53 = vld [vmem:[#allocation5 + $0x38] sm:$0xf0]  ;;  %v351_v56 = vor.u32 %v459_v48, %v350_v47 }
  0x18   :  { %266 = vmatpush.bf16.msra.mxu2 %v371_v34  ;;  %v474_v54 = vld [vmem:[#allocation5 + $0xb4] sm:$0xf]  ;;  %v416_v55 = vld [vmem:[#allocation5 + $0xb8] sm:$0xf0]  ;;  %v415_v57 = vor.u32 %v475_v51, %v414_v49  ;;  %v355_v58 = vor.u32 %v458_v52, %v352_v53  ;;  %v342_v59 = vld [vmem:[#allocation5 + $0x20] sm:$0xf] }
  0x19   :  { %279 = vmatpush.bf16.msra.mxu3 %v435_v38  ;;  %v457_v60 = vld [vmem:[#allocation5 + $0x24] sm:$0xf0]  ;;  %v406_v61 = vld [vmem:[#allocation5 + $0xa0] sm:$0xf]  ;;  %v419_v62 = vor.u32 %v474_v54, %v416_v55  ;;  %v456_v0 = vld [vmem:[#allocation5 + $0x24] sm:$0xf] }
  0x1a   :  { %241 = vmatpush.bf16.msra.mxu0 %v359_v44  ;;  %v473_v63 = vld [vmem:[#allocation5 + $0xa4] sm:$0xf0]  ;;  %v344_v1 = vld [vmem:[#allocation5 + $0x28] sm:$0xf0]  ;;  %v472_v2 = vld [vmem:[#allocation5 + $0xa4] sm:$0xf]  ;;  %v343_v4 = vor.u32 %v457_v60, %v342_v59 }
  0x1b   :  { %254 = vmatpush.bf16.msra.mxu1 %v423_v45  ;;  %v408_v3 = vld [vmem:[#allocation5 + $0xa8] sm:$0xf0]  ;;  %v407_v5 = vor.u32 %v473_v63, %v406_v61  ;;  %v347_v6 = vor.u32 %v456_v0, %v344_v1  ;;  %v334_v7 = vld [vmem:[#allocation5 + $0x10] sm:$0xf]  ;;  %v455_v8 = vld [vmem:[#allocation5 + $0x14] sm:$0xf0] }
  0x1c   :  { %267 = vmatpush.bf16.msra.mxu2 %v363_v46  ;;  %v398_v9 = vld [vmem:[#allocation5 + $0x90] sm:$0xf]  ;;  %v411_v10 = vor.u32 %v472_v2, %v408_v3  ;;  %v471_v11 = vld [vmem:[#allocation5 + $0x94] sm:$0xf0]  ;;  %v454_v12 = vld [vmem:[#allocation5 + $0x14] sm:$0xf]  ;;  %v335_v16 = vor.u32 %v455_v8, %v334_v7 }
  0x1d   :  { %280 = vmatpush.bf16.msra.mxu3 %v427_v50  ;;  %v336_v13 = vld [vmem:[#allocation5 + $0x18] sm:$0xf0]  ;;  %v470_v14 = vld [vmem:[#allocation5 + $0x94] sm:$0xf]  ;;  %v399_v17 = vor.u32 %v471_v11, %v398_v9  ;;  %v326_v19 = vld [vmem:[#allocation5] sm:$0xf] }
  0x1e   :  { %242 = vmatpush.bf16.msra.mxu0 %v351_v56  ;;  %v400_v15 = vld [vmem:[#allocation5 + $0x98] sm:$0xf0]  ;;  %v339_v18 = vor.u32 %v454_v12, %v336_v13  ;;  %v453_v20 = vld [vmem:[#allocation5 + $0x4] sm:$0xf0]  ;;  %v390_v21 = vld [vmem:[#allocation5 + $0x80] sm:$0xf] }
  0x1f   :  { %255 = vmatpush.bf16.msra.mxu1 %v415_v57  ;;  %v403_v22 = vor.u32 %v470_v14, %v400_v15  ;;  %v469_v23 = vld [vmem:[#allocation5 + $0x84] sm:$0xf0]  ;;  %v452_v24 = vld [vmem:[#allocation5 + $0x4] sm:$0xf]  ;;  %v328_v25 = vld [vmem:[#allocation5 + $0x8] sm:$0xf0]  ;;  %v327_v28 = vor.u32 %v453_v20, %v326_v19 }
  0x20   :  { %268 = vmatpush.bf16.msra.mxu2 %v355_v58  ;;  %v468_v26 = vld [vmem:[#allocation5 + $0x84] sm:$0xf]  ;;  %v392_v27 = vld [vmem:[#allocation5 + $0x88] sm:$0xf0]  ;;  %v42_v29 = vld [vmem:[#allocation2] sm:$0xff]  ;;  %v391_v30 = vor.u32 %v469_v23, %v390_v21  ;;  %v331_v31 = vor.u32 %v452_v24, %v328_v25  ;;  %s573_s0 = smov [#allocation7]  }
  0x21   :  { %281 = vmatpush.bf16.msra.mxu3 %v419_v62  ;;  %v43_v32 = vld [vmem:[#allocation2 + $0x8] sm:$0xff]  ;;  %v395_v33 = vor.u32 %v468_v26, %v392_v27  ;;  %v44_v34 = vpack.c.bf16 %v42_v29, %v42_v29  ;;  %s311_s1 = sshll.u32 %s573_s0, 4  ;;  %s313_s23 = sshll.u32 %s600_s2, 4  ;;  %s312_s1 = int_to_ptr.vmem [resolvable:$true] %s311_s1  ;;  %s314_s23 = int_to_ptr.hbm [resolvable:$true] %s313_s23 }
  0x22   :  { %243 = vmatpush.bf16.msra.mxu0 %v343_v4  ;;  %v45_v35 = vpack.c.bf16 %v43_v32, %v43_v32 }
  0x23   :  { %256 = vmatpush.bf16.msra.mxu1 %v407_v5 }
  0x24   :  { %269 = vmatpush.bf16.msra.mxu2 %v347_v6 }
  0x25   :  { %282 = vmatpush.bf16.msra.mxu3 %v411_v10 }
  0x26   :  { %244 = vmatpush.bf16.msra.mxu0 %v335_v16 }
  0x27   :  { %257 = vmatpush.bf16.msra.mxu1 %v399_v17 }
  0x28   :  { %270 = vmatpush.bf16.msra.mxu2 %v339_v18 }
  0x29   :  { %283 = vmatpush.bf16.msra.mxu3 %v403_v22 }
  0x2a   :  { %245 = vmatpush.bf16.msra.mxu0 %v327_v28 }
  0x2b   :  { %258 = vmatpush.bf16.msra.mxu1 %v391_v30 }
  0x2c   :  { %271 = vmatpush.bf16.msra.mxu2 %v331_v31 }
  0x2d   :  { %284 = vmatpush.bf16.msra.mxu3 %v395_v33  ;;  %246 = vmatmul.bf16.vlgmr.msra.gmra.mxu0 %v44_v34 }
  0x2e   :  { %259 = vmatmul.bf16.vlgmr.msra.gmra.mxu1 %v45_v35 }
  0x2f   :  { %272 = vmatmul.bf16.vlgmr.msra.gmra.mxu2 %v44_v34 }
  0x30   :  { %285 = vmatmul.bf16.vlgmr.msra.gmra.mxu3 %v45_v35 }
  0xaa   :  { %v247_v36 = vpop.f32.mrf.mxu0 }
  0xab   :  { %v260_v37 = vpop.f32.mrf.mxu1 }
  0xac   :  { %v261_v38 = vadd.f32 %v260_v37, %v247_v36 }
  0xae   :  { %v290_v42 = vmul.f32 %v261_v38, %v261_v38 }
  0xb2   :  { %v273_v39 = vpop.f32.mrf.mxu2  ;;  %v249_v41 = vpop.f32.mrf.mxu0 }
  0xb3   :  { %v286_v40 = vpop.f32.mrf.mxu3  ;;  %v262_v44 = vpop.f32.mrf.mxu1 }
  0xb4   :  { %v287_v43 = vadd.f32 %v286_v40, %v273_v39 }
  0xb6   :  { %v291_v45 = vmul.f32 %v287_v43, %v287_v43 }
  0xb8   :  { %v292_v46 = vadd.f32 %v291_v45, %v290_v42 }
  0xba   :  { %489 = vrsqrt.f32 %v292_v46  ;;  %v275_v47 = vpop.f32.mrf.mxu2  ;;  %vm300_vm0 = vcmp.eq.f32.partialorder %v292_v46, inf  ;;  %v303_v56 = vand.u32 2147483648, %v292_v46  ;;  %vm302_vm1 = vcmp.eq.f32.partialorder %v292_v46, 0.0 }
  0xbb   :  { %v288_v48 = vpop.f32.mrf.mxu3 }
  0xc0   :  { %v490_v49 = vpop.eup %489 }
  0xc1   :  { %v294_v50 = vmul.f32 %v490_v49, %v292_v46 }
  0xc3   :  { %v295_v51 = vmul.f32 %v490_v49, %v294_v50 }
  0xc5   :  { %v296_v52 = vmul.f32 0.5, %v295_v51 }
  0xc7   :  { %v297_v53 = vsub.f32 1.5, %v296_v52 }
  0xc9   :  { %v298_v54 = vmul.f32 %v490_v49, %v297_v53 }
  0xcb   :  { %v299_v55 = vmul.f32 %v298_v54, %v292_v46 }
  0xcd   :  { %v301_v57 = vsel %vm300_vm0, %v292_v46, %v299_v55 }
  0xce   :  { %v304_v58 = vsel %vm302_vm1, %v303_v56, %v301_v57 }
  0xcf   :  { %305 = vst [vmem:[#allocation7] sm:$0xff] %v304_v58 }
  0xd0   :  { %316 = dma.vmem_to_hbm [thread:$0]  %s312_s1, 128, %s314_s23, [#allocation4]  }
  0xd1   :  { %567 = dma.done.wait [#allocation4], 128  }
  0xd2   :  { %568 = vsyncadd [#allocation4], 4294967168 }
  0xd3   :  { %321 = vsyncpa [#allocation3], 1 }
  0xd4   :  { %322 = vsyncpa [#allocation6], 1 }
  0xd5   :  { %323 = vsyncpa [#allocation4], 1 }

</bundles_post_ra>
